<compile_context>
chip_gen: v7x
topology: tpu7x:2x2x1
jax: 0.10.0
libtpu: 0.0.40
codegen_flags: <defaults>
</compile_context>

<pallas_src>
import jax
import jax.numpy as jnp
from jax.experimental import pallas as pl
from jax.experimental.pallas import tpu as pltpu

LANE = 128


def _make_ln2d_kernel(eps: float):
    def ln2d_kernel(x_ref, w_ref, b_ref, o_ref):
        # x_ref: (1, C, hw_t) tile; w_ref / b_ref: (1, C, 1) fp32.
        x = x_ref[...].astype(jnp.float32)                     # stats in fp32
        mu = jnp.mean(x, axis=1, keepdims=True)                # (1, 1, hw_t)
        # Single-pass variance (biased, like torch .mean()); clamp guards the
        # tiny negative values E[x^2] - mu^2 can produce from cancellation.
        var = jnp.maximum(jnp.mean(x * x, axis=1, keepdims=True) - mu * mu, 0.0)
        rstd = jax.lax.rsqrt(var + eps)                        # EUP, ~free slot
        o_ref[...] = ((x - mu) * rstd * w_ref[...] + b_ref[...]).astype(o_ref.dtype)
    return ln2d_kernel


def _pick_hw_tile(HW: int, C: int, N: int, itemsize: int,
                  target_tile_bytes: int = 2 << 20) -> int:
    """Lane tile (multiple of 128) sized so C * hw_t * itemsize ~= 2 MiB."""
    hw_ceil = -(-HW // LANE) * LANE
    lanes = (target_tile_bytes // max(1, C * itemsize)) // LANE * LANE
    lanes = max(4 * LANE, lanes)          # >= 512 lanes: amortize step overhead
    lanes = min(lanes, hw_ceil)
    # v7x megacore: ensure >= 2 grid steps when the batch alone would leave a
    # TensorCore idle.
    if N == 1 and lanes >= HW and HW > LANE:
        lanes = -(-((HW + 1) // 2) // LANE) * LANE
    return max(LANE, lanes)


def layer_norm_2d(x, weight, bias, eps: float = 1e-6):
    """x: (N, C, H, W); weight, bias: (C,). Returns (N, C, H, W)."""
    N, C, H, W = x.shape
    HW = H * W
    itemsize = jnp.dtype(x.dtype).itemsize

    hw_t = _pick_hw_tile(HW, C, N, itemsize)
    n_hw = pl.cdiv(HW, hw_t)

    x3 = x.reshape(N, C, HW)
    w3 = weight.astype(jnp.float32).reshape(1, C, 1)   # cast/reshape once here
    b3 = bias.astype(jnp.float32).reshape(1, C, 1)

    cost = pl.CostEstimate(
        flops=8 * N * C * HW,
        transcendentals=N * HW,
        bytes_accessed=2 * N * C * HW * itemsize + 2 * C * 4,
    )

    out3 = pl.pallas_call(
        _make_ln2d_kernel(eps),
        out_shape=jax.ShapeDtypeStruct((N, C, HW), x.dtype),
        grid_spec=pltpu.PrefetchScalarGridSpec(
            num_scalar_prefetch=0,
            grid=(N, n_hw),
            in_specs=[
                pl.BlockSpec((1, C, hw_t), lambda n, h: (n, 0, h)),
                pl.BlockSpec((1, C, 1), lambda n, h: (0, 0, 0)),
                pl.BlockSpec((1, C, 1), lambda n, h: (0, 0, 0)),
            ],
            out_specs=pl.BlockSpec((1, C, hw_t), lambda n, h: (n, 0, h)),
        ),
        compiler_params=pltpu.CompilerParams(
            dimension_semantics=("parallel", "parallel")),
        cost_estimate=cost,
    )(x3, w3, b3)

    return out3.reshape(N, C, H, W)


def layer_norm_2d_ref(x, weight, bias, eps: float = 1e-6):
    """Pure-JAX reference matching the PyTorch forward."""
    mu = jnp.mean(x, axis=1, keepdims=True)
    var = jnp.mean((x - mu) ** 2, axis=1, keepdims=True)
    y = (x - mu) / jnp.sqrt(var + eps)
    return weight.reshape(1, -1, 1, 1) * y + bias.reshape(1, -1, 1, 1)


if __name__ == "__main__":
    key = jax.random.PRNGKey(0)
    eps = 1e-6

    # Case 1: lane-aligned spatial (HW = 256, multiple of 128).
    N, C, H, W = 2, 4, 16, 16
    x = jax.random.normal(key, (N, C, H, W), dtype=jnp.float32)
    weight = jnp.ones((C,), dtype=jnp.float32)   # LayerNorm2d init: ones
    bias = jnp.zeros((C,), dtype=jnp.float32)    # LayerNorm2d init: zeros

    out = jax.block_until_ready(layer_norm_2d(x, weight, bias, eps))
    ref = layer_norm_2d_ref(x, weight, bias, eps)
    assert out.shape == (N, C, H, W)
    assert jnp.allclose(out, ref, atol=1e-5, rtol=1e-5), "mismatch vs reference"

    # Case 2: ragged spatial (HW = 196) exercises the partial last-tile path
    # (masked store, no wrapper padding), plus non-trivial weight/bias.
    key1, key2, key3 = jax.random.split(key, 3)
    N2, C2, H2, W2 = 2, 8, 14, 14
    x2 = jax.random.normal(key1, (N2, C2, H2, W2), dtype=jnp.float32)
    w2 = jax.random.normal(key2, (C2,), dtype=jnp.float32)
    b2 = jax.random.normal(key3, (C2,), dtype=jnp.float32)

    out2 = jax.block_until_ready(layer_norm_2d(x2, w2, b2, eps))
    ref2 = layer_norm_2d_ref(x2, w2, b2, eps)
    assert out2.shape == (N2, C2, H2, W2)
    assert jnp.allclose(out2, ref2, atol=1e-5, rtol=1e-5), "mismatch vs reference (ragged)"

    # Case 3: single image, forces the N==1 split so the grid has >= 2 steps.
    N3, C3, H3, W3 = 1, 4, 16, 16
    x3 = jax.random.normal(key1, (N3, C3, H3, W3), dtype=jnp.float32)
    w3 = jnp.ones((C3,), dtype=jnp.float32)
    b3 = jnp.zeros((C3,), dtype=jnp.float32)
    out3 = jax.block_until_ready(layer_norm_2d(x3, w3, b3, eps))
    ref3 = layer_norm_2d_ref(x3, w3, b3, eps)
    assert jnp.allclose(out3, ref3, atol=1e-5, rtol=1e-5), "mismatch vs reference (N=1)"

    print("KERNEL_OK")
</pallas_src>

<mosaic_0001>
module attributes {stable_mosaic.version = 11 : i64} {
  func.func @ln2d_kernel(%arg0: i32, %arg1: i32, %arg2: memref<1x4x256xf32, #tpu.memory_space<vmem>>, %arg3: memref<1x4x1xf32, #tpu.memory_space<vmem>>, %arg4: memref<1x4x1xf32, #tpu.memory_space<vmem>>, %arg5: memref<1x4x256xf32, #tpu.memory_space<vmem>>) attributes {dimension_semantics = [#tpu.dimension_semantics<parallel>, #tpu.dimension_semantics<parallel>], iteration_bounds = array<i64: 2, 1>, scalar_prefetch = 0 : i64, scratch_operands = 0 : i64, tpu.core_type = #tpu.core_type<tc>, window_params = [{transform_indices = @transform_0, window_bounds = array<i64: 1, 4, 256>}, {pipeline_mode = #tpu.pipeline_mode<synchronous>, transform_indices = @transform_1, window_bounds = array<i64: 1, 4, 1>}, {pipeline_mode = #tpu.pipeline_mode<synchronous>, transform_indices = @transform_2, window_bounds = array<i64: 1, 4, 1>}, {transform_indices = @transform_3, window_bounds = array<i64: 1, 4, 256>}]} {
    %c0 = arith.constant 0 : index
    %c0_0 = arith.constant 0 : index
    %c0_1 = arith.constant 0 : index
    %0 = vector.load %arg2[%c0, %c0_0, %c0_1] : memref<1x4x256xf32, #tpu.memory_space<vmem>>, vector<1x4x256xf32>
    %cst = arith.constant dense<0.000000e+00> : vector<1x256xf32>
    %1 = vector.multi_reduction <add>, %0, %cst [1] : vector<1x4x256xf32> to vector<1x256xf32>
    %2 = vector.shape_cast %1 : vector<1x256xf32> to vector<1x1x256xf32>
    %cst_2 = arith.constant 4.000000e+00 : f32
    %3 = vector.broadcast %cst_2 : f32 to vector<1x1x256xf32>
    %4 = arith.divf %2, %3 : vector<1x1x256xf32>
    %5 = arith.mulf %0, %0 : vector<1x4x256xf32>
    %cst_3 = arith.constant dense<0.000000e+00> : vector<1x256xf32>
    %6 = vector.multi_reduction <add>, %5, %cst_3 [1] : vector<1x4x256xf32> to vector<1x256xf32>
    %7 = vector.shape_cast %6 : vector<1x256xf32> to vector<1x1x256xf32>
    %cst_4 = arith.constant 4.000000e+00 : f32
    %8 = vector.broadcast %cst_4 : f32 to vector<1x1x256xf32>
    %9 = arith.divf %7, %8 : vector<1x1x256xf32>
    %10 = arith.mulf %4, %4 : vector<1x1x256xf32>
    %11 = arith.subf %9, %10 : vector<1x1x256xf32>
    %cst_5 = arith.constant 0.000000e+00 : f32
    %12 = vector.broadcast %cst_5 : f32 to vector<1x1x256xf32>
    %13 = arith.maximumf %11, %12 : vector<1x1x256xf32>
    %cst_6 = arith.constant 9.99999997E-7 : f32
    %14 = vector.broadcast %cst_6 : f32 to vector<1x1x256xf32>
    %15 = arith.addf %13, %14 : vector<1x1x256xf32>
    %16 = math.rsqrt %15 : vector<1x1x256xf32>
    %17 = vector.broadcast %4 : vector<1x1x256xf32> to vector<1x4x256xf32>
    %18 = arith.subf %0, %17 : vector<1x4x256xf32>
    %19 = vector.broadcast %16 : vector<1x1x256xf32> to vector<1x4x256xf32>
    %20 = arith.mulf %18, %19 : vector<1x4x256xf32>
    %c0_7 = arith.constant 0 : index
    %c0_8 = arith.constant 0 : index
    %c0_9 = arith.constant 0 : index
    %21 = vector.load %arg3[%c0_7, %c0_8, %c0_9] : memref<1x4x1xf32, #tpu.memory_space<vmem>>, vector<1x4x1xf32>
    %22 = vector.broadcast %21 : vector<1x4x1xf32> to vector<1x4x256xf32>
    %23 = arith.mulf %20, %22 : vector<1x4x256xf32>
    %c0_10 = arith.constant 0 : index
    %c0_11 = arith.constant 0 : index
    %c0_12 = arith.constant 0 : index
    %24 = vector.load %arg4[%c0_10, %c0_11, %c0_12] : memref<1x4x1xf32, #tpu.memory_space<vmem>>, vector<1x4x1xf32>
    %25 = vector.broadcast %24 : vector<1x4x1xf32> to vector<1x4x256xf32>
    %26 = arith.addf %23, %25 : vector<1x4x256xf32>
    %c0_13 = arith.constant 0 : index
    %c0_14 = arith.constant 0 : index
    %c0_15 = arith.constant 0 : index
    %27 = vector.load %arg5[%c0_13, %c0_14, %c0_15] : memref<1x4x256xf32, #tpu.memory_space<vmem>>, vector<1x4x256xf32>
    tpu.vector_store %arg5[%c0_13, %c0_14, %c0_15], %26 {strides = array<i32>} : memref<1x4x256xf32, #tpu.memory_space<vmem>>, vector<1x4x256xf32>,
    return
  }
  func.func @transform_0(%arg0: i32, %arg1: i32) -> (i32, i32, i32) {
    %c0_i32 = arith.constant 0 : i32
    %c0_i32_0 = arith.constant 0 : i32
    return %arg0, %c0_i32, %arg1 : i32, i32, i32
  }
  func.func @transform_1(%arg0: i32, %arg1: i32) -> (i32, i32, i32) {
    %c0_i32 = arith.constant 0 : i32
    %c0_i32_0 = arith.constant 0 : i32
    %c0_i32_1 = arith.constant 0 : i32
    %c0_i32_2 = arith.constant 0 : i32
    return %c0_i32, %c0_i32_0, %c0_i32_1 : i32, i32, i32
  }
  func.func @transform_2(%arg0: i32, %arg1: i32) -> (i32, i32, i32) {
    %c0_i32 = arith.constant 0 : i32
    %c0_i32_0 = arith.constant 0 : i32
    %c0_i32_1 = arith.constant 0 : i32
    %c0_i32_2 = arith.constant 0 : i32
    return %c0_i32, %c0_i32_0, %c0_i32_1 : i32, i32, i32
  }
  func.func @transform_3(%arg0: i32, %arg1: i32) -> (i32, i32, i32) {
    %c0_i32 = arith.constant 0 : i32
    %c0_i32_0 = arith.constant 0 : i32
    return %arg0, %c0_i32, %arg1 : i32, i32, i32
  }
}

</mosaic_0001>

<bundles_post_ra>
// kernel: tpu_custom_call.1
= control target key start
LH: loop header
LB: loop body
LE: loop exit
PB: predicated region body
PF: predicated region fallthrough
CT: control target
= control target key end

     0   :  { %8 = vsyncpa [#allocation3], 0  ;;  %s806_s0 = inlined_call_operand.hbm [shape: f32[2,4,256], index: 0, kind: input, shape index: {}]   ;;  %s807_s1 = inlined_call_operand.vmem [shape: f32[1,4,1], index: 1, kind: input, shape index: {}]   ;;  %s808_s2 = inlined_call_operand.vmem [shape: f32[1,4,1], index: 2, kind: input, shape index: {}]   ;;  %s809_s3 = inlined_call_operand.hbm [shape: f32[2,4,256], index: 3, kind: output, shape index: {}]  }
   0x1   :  { %10 = vsyncpa [#allocation3 + $0x1], 0 }
   0x2   :  { %11 = vsyncpa [#allocation4], 0 }
   0x3   :  { %13 = vsyncpa [#allocation4 + $0x1], 0  ;;  %s624_s12 = smov 0   ;;  %s626_s13 = smov 0  }
   0x4   :  { %s628_s14 = smov 0   ;;  %s630_s15 = smov 0  }
   0x5   :  { %s632_s16 = smov 0   ;;  %s634_s17 = smov 0  }
   0x6 LB: > { %s399_s18 = sadd.s32 4294967295, %s598_s17   ;;  %s400_s19 = sadd.s32 4294967294, %s598_s17   ;;  %s598_s17 = sphi %s634_s17, %s19_s17   ;;  %s594_s16 = sphi %s632_s16, %s825_s16   ;;  %s590_s15 = sphi %s630_s15, %s824_s15   ;;  %s586_s14 = sphi %s628_s14, %s823_s14   ;;  %s582_s13 = sphi %s626_s13, %s822_s13   ;;  %s578_s12 = sphi %s624_s12, %s821_s12  }
   0x7   : > { %s31_s20 = sadd.s32 1, %s594_s16  ;;  %s40_s21 = sadd.s32 1, %s586_s14 }
   0x8   : > { %p33_p0 = scmp.ge.s32.totalorder %s31_s20, 2  ;;  %p47_p1 = scmp.ne.s32.totalorder %s586_s14, %s582_s13 }
   0x9   : > { %p48_p2 = scmp.eq.s32.totalorder %s598_s17, 0  ;;  %p53_p3 = scmp.ne.s32.totalorder %s582_s13, %s578_s12 }
   0xa   : > { %s827_s20 = smov (%p33_p0, %s31_s20), 0  ;;  %p54_p5 = scmp.eq.s32.totalorder %s399_s18, 0 }
   0xb   : > { %p665_p4 = por %p48_p2, %p47_p1  ;;  %s35_s23 = ssub.s32 %s594_s16, %s827_s20 }
   0xc   : > { %p121_p6 = scmp.eq.s32.totalorder %s399_s18, 1  ;;  %p38_p7 = scmp.eq.s32.totalorder %s35_s23, 0 }
   0xd   : > { %p671_p8 = por %p54_p5, %p53_p3  ;;  %p127_p10 = scmp.eq.s32.totalorder %s400_s19, 1 }
   0xe   : > { %p675_p9 = por %p121_p6, %p47_p1  ;;  %p428_p13 = scmp.lt.s32.totalorder %s598_s17, 2 }
   0xf   : > { %s680_s26 = scalar_select %p38_p7, %s586_s14, %s40_s21  }
  0x10   : > { %s813_s25 = scalar_select %p675_p9, 1, 0 }
  0x11   : > { %p682_p11 = por %p127_p10, %p53_p3  ;;  %s153_s28 = sand.u32 1, %s586_s14  }
  0x12   : > { %s403_s29 = sshll.u32 %s153_s28, 3  ;;  %s414_s30 = sshll.u32 %s594_s16, 7 }
  0x13   : > { %s814_s27 = scalar_select %p682_p11, 1, 0 }
  0x14   : > { %s693_s6 = scalar_lea.hbm %s806_s0, %s414_s30  ;;  %s157_s7 = scalar_lea.vmem [#allocation2], %s403_s29 }
  0x15   : > { %s167_s8 = sshll.u32 %s157_s7, 4  ;;  %p699_p0 = pnand %p428_p13, %p665_p4  ;;  %s695_s8 = int_to_ptr.vmem [resolvable:$true] %s167_s8 }
  0x16   : > { %s154_s10 = scalar_lea.sflag [#allocation3], %s153_s28  ;;  %s486_s11 = scalar_lea.hbm %s693_s6, 128 }
  0x17   : > { %p487_p3 = scmp.ne.s32.totalorder %s693_s6, %s486_s11  ;;  %p488_p5 = pneg %p699_p0 }
  0x18   : > { %s491_s21 = scalar_lea.hbm %s806_s0, 256  ;;  %p492_p4 = scmp.lt.u32.totalorder %s693_s6, %s806_s0 }
  0x19   : > { %p489_p6 = pnand %p488_p5, %p487_p3  ;;  %p493_p10 = scmp.lt.u32.totalorder %s491_s21, %s486_s11 }
  0x1a   : > { %p495_p12 = scmp.lt.u32.totalorder %s486_s11, %s693_s6 }
  0x1b   : > { %p490_p7 = pneg %p489_p6  ;;  %p494_p13 = por %p493_p10, %p492_p4 }
  0x1d   : > { %p496_p1 = por %p495_p12, %p494_p13 }
  0x1f   : > { %p497_p2 = pnand %p496_p1, %p490_p7 }
  0x21   : > { %500 = shalt.err (!%p497_p2)
}
  0x22   : > { %s501_s28 = scalar_lea.vmem %s695_s8, 128  ;;  %s600_s29 = smov [#allocation2]  }
  0x23   : > { %p502_p3 = scmp.ne.s32.totalorder %s695_s8, %s501_s28  ;;  %s506_s30 = sshll.u32 %s600_s29, 4  ;;  %s507_s30 = int_to_ptr.vmem [resolvable:$false] %s506_s30 }
  0x24   : > { %s508_s4 = scalar_lea.vmem %s507_s30, 256  ;;  %p509_p9 = scmp.lt.s32.totalorder %s695_s8, %s507_s30 }
  0x25   : > { %p504_p6 = pnand %p502_p3, %p488_p5  ;;  %p510_p4 = scmp.lt.s32.totalorder %s508_s4, %s501_s28 }
  0x27   : > { %p505_p11 = pneg %p504_p6  ;;  %p511_p10 = por %p510_p4, %p509_p9 }
  0x29   : > { %p512_p12 = pnand %p511_p10, %p505_p11 }
  0x2b   : > { %515 = shalt.err (!%p512_p12)
}
  0x2c   : > { %423 = dma.hbm_to_vmem [thread:$0]  (!%p699_p0), %s693_s6, 128, %s695_s8, %s154_s10  }
  0x2d   : > { %p816_p1 = scmp.lt.s32.totalorder %s598_s17, 3  ;;  %p817_p2 = scmp.ge.s32.totalorder %s598_s17, 1 }
  0x2f   : > { %p173_p5 = pnand %p817_p2, %p816_p1 }
  0x30   : > { %s735_s5 = sand.u32 (!%p173_p5), 1, %s582_s13  }
  0x31   : > { %176 = sbr.rel (%p173_p5) target bundleno = 209 (0xd1), region = 32  ;;  %s407_s7 = sshll.u32 (!%p173_p5), %s735_s5, 3 }
  0x32   : > { %s179_s11 = scalar_lea.sflag (!%p173_p5), [#allocation3], %s735_s5  ;;  %s182_s9 = scalar_lea.vmem (!%p173_p5), [#allocation2], %s407_s7 }
  0x38   : > { %569 = dma.done.wait (%p671_p8), %s179_s11, 128  }
  0x39   : > { %571 = vsyncadd (%p671_p8), %s179_s11, 4294967168  ;;  %v601_v0 = vmov 0   ;;  %v269_v1 = vld [vmem:[%s807_s1] sm:$0xf]  ;;  %vm211_vm0 = vcmask 1043456   ;;  %v277_v49 = vlaneseq  ;;  %s415_s24 = sshll.u32 %s590_s15, 7 }
  0x3a   : > { %480 = vset.pattern.permute.xlu0 %v601_v0  ;;  %v283_v2 = vld [vmem:[%s808_s2] sm:$0xf]  ;;  %v602_v47 = vmov 839922192   ;;  %s204_s19 = scalar_lea.vmem [#allocation5], %s407_s7  ;;  %s757_s28 = scalar_lea.hbm %s809_s3, %s415_s24 }
  0x3b   : > { %272 = vperm.xlu0 %480, %v269_v1   ;;  %v207_v3 = vld [vmem:[%s182_s9] sm:$0xff]  ;;  %v275_v48 = vunpack.c.l.s4 %v602_v47  ;;  %v278_v52 = vshrl.u32 %v277_v49, 7  ;;  %s315_s21 = sshll.u32 %s204_s19, 4  ;;  %s299_s29 = scalar_lea.sflag [#allocation4], %s735_s5  ;;  %s759_s21 = int_to_ptr.vmem [resolvable:$true] %s315_s21 }
  0x3c   : > { %v209_v4 = vcombine.high %v207_v3, %v207_v3  ;;  %v229_v5 = vmul.f32 %v207_v3, %v207_v3  ;;  %v212_v6 = vsel %vm211_vm0, %v207_v3, 0.0  ;;  %s516_s30 = scalar_lea.vmem %s759_s21, 128  ;;  %p818_p9 = scmp.ne.s32.totalorder %s813_s25, 0 }
  0x3d   : > { %v213_v9 = vrot.slane %v212_v6, 4  ;;  %v276_v51 = vunpack.c.0.s8 %v275_v48  ;;  %p517_p8 = scmp.ne.s32.totalorder %s759_s21, %s516_s30  ;;  %s603_s15 = smov [#allocation5]  }
  0x3e   : > { %v219_v7 = vsel %vm211_vm0, %v209_v4, 0.0  ;;  %v231_v8 = vcombine.high %v229_v5, %v229_v5  ;;  %v233_v11 = vsel %vm211_vm0, %v229_v5, 0.0  ;;  %s520_s4 = sshll.u32 %s603_s15, 4  ;;  %s521_s4 = int_to_ptr.vmem [resolvable:$false] %s520_s4 }
  0x3f   : > { %286 = vperm.xlu0 %480, %v283_v2   ;;  %v220_v10 = vrot.slane %v219_v7, 4  ;;  %v214_v13 = vadd.f32 %v213_v9, %v212_v6  ;;  %v234_v14 = vrot.slane %v233_v11, 4  ;;  %v279_v55 = vsub.s32 %v276_v51, %v278_v52  ;;  %p518_p11 = pnand %p517_p8, %p818_p9  ;;  %s522_s7 = scalar_lea.vmem %s521_s4, 256 }
  0x40   : > { %v240_v12 = vsel %vm211_vm0, %v231_v8, 0.0  ;;  %p523_p7 = scmp.lt.s32.totalorder %s759_s21, %s521_s4  ;;  %p524_p13 = scmp.lt.s32.totalorder %s522_s7, %s516_s30 }
  0x41   : > { %v221_v15 = vadd.f32 %v220_v10, %v219_v7  ;;  %v241_v16 = vrot.slane %v240_v12, 4  ;;  %v215_v17 = vrot.slane %v214_v13, 2  ;;  %v235_v18 = vadd.f32 %v234_v14, %v233_v11  ;;  %p519_p0 = pneg %p518_p11 }
  0x42   : > { %p525_p3 = por %p524_p13, %p523_p7 }
  0x43   : > { %v222_v19 = vrot.slane %v221_v15, 2  ;;  %v242_v20 = vadd.f32 %v241_v16, %v240_v12  ;;  %v216_v21 = vadd.f32 %v215_v17, %v214_v13  ;;  %v236_v22 = vrot.slane %v235_v18, 2 }
  0x44   : > { %p526_p6 = pnand %p525_p3, %p519_p0 }
  0x45   : > { %v223_v23 = vadd.f32 %v222_v19, %v221_v15  ;;  %v243_v24 = vrot.slane %v242_v20, 2  ;;  %v217_v25 = vrot.slane %v216_v21, 1  ;;  %v237_v26 = vadd.f32 %v236_v22, %v235_v18 }
  0x47   : > { %v224_v27 = vrot.slane %v223_v23, 1  ;;  %v244_v28 = vadd.f32 %v243_v24, %v242_v20  ;;  %v218_v29 = vadd.f32 %v217_v25, %v216_v21  ;;  %v238_v30 = vrot.slane %v237_v26, 1 }
  0x49   : > { %v225_v31 = vadd.f32 %v224_v27, %v223_v23  ;;  %v245_v32 = vrot.slane %v244_v28, 1  ;;  %v227_v33 = vmul.f32 0.25, %v218_v29  ;;  %v239_v34 = vadd.f32 %v238_v30, %v237_v26 }
  0x4b   : > { %v228_v35 = vmul.f32 0.25, %v225_v31  ;;  %v246_v36 = vadd.f32 %v245_v32, %v244_v28  ;;  %v247_v37 = vmul.f32 0.25, %v239_v34  ;;  %v249_v38 = vmul.f32 %v227_v33, %v227_v33 }
  0x4d   : > { %v248_v39 = vmul.f32 0.25, %v246_v36  ;;  %v250_v40 = vmul.f32 %v228_v35, %v228_v35  ;;  %v251_v41 = vsub.f32 %v247_v37, %v249_v38  ;;  %v261_v53 = vcombine.low %v227_v33, %v228_v35 }
  0x4f   : > { %v252_v42 = vsub.f32 %v248_v39, %v250_v40  ;;  %v253_v43 = vmax.f32 %v251_v41, 0.0  ;;  %v263_v56 = vsub.f32 %v207_v3, %v261_v53 }
  0x51   : > { %v254_v44 = vmax.f32 %v252_v42, 0.0  ;;  %v255_v45 = vadd.f32 1e-06, %v253_v43 }
  0x53   : > { %v256_v46 = vadd.f32 1e-06, %v254_v44  ;;  %482 = vrsqrt.f32 %v255_v45 }
  0x55   : > { %484 = vrsqrt.f32 %v256_v46 }
  0x5d   : > { %v483_v50 = vpop.eup %482 }
  0x5f   : > { %v485_v54 = vpop.eup %484 }
  0x60   : > { %v266_v57 = vcombine.low %v483_v50, %v485_v54 }
  0x62   : > { %v268_v59 = vmul.f32 %v266_v57, %v263_v56 }
  0xba   : > { %v273_v58 = vpop.permute.xlu0 %272 }
  0xbb   : > { %v280_v60 = vrot.slane %v273_v58, %v279_v55 }
  0xbd   : > { %v282_v62 = vmul.f32 %v280_v60, %v268_v59 }
  0xbe   : > { %v287_v61 = vpop.permute.xlu0 %286 }
  0xbf   : > { %v294_v63 = vrot.slane %v287_v61, %v279_v55 }
  0xc1   : > { %v296_v0 = vadd.f32 %v294_v63, %v282_v62 }
  0xc3   : > { %297 = vst [vmem:[%s204_s19] sm:$0xff] %v296_v0 }
  0xc4   : > { %529 = shalt.err (!%p526_p6)
}
  0xc5   : > { %s530_s5 = scalar_lea.hbm %s757_s28, 128  ;;  %s534_s6 = scalar_lea.hbm %s809_s3, 256 }
  0xc6   : > { %p531_p4 = scmp.ne.s32.totalorder %s757_s28, %s530_s5  ;;  %p535_p1 = scmp.lt.u32.totalorder %s757_s28, %s809_s3 }
  0xc7   : > { %p536_p2 = scmp.lt.u32.totalorder %s534_s6, %s530_s5  ;;  %p538_p8 = scmp.lt.u32.totalorder %s530_s5, %s757_s28 }
  0xc8   : > { %p532_p10 = pnand %p531_p4, %p818_p9 }
  0xc9   : > { %p537_p5 = por %p536_p2, %p535_p1 }
  0xca   : > { %p533_p12 = pneg %p532_p10 }
  0xcb   : > { %p539_p11 = por %p538_p8, %p537_p5 }
  0xcd   : > { %p540_p0 = pnand %p539_p11, %p533_p12 }
  0xcf   : > { %543 = shalt.err (!%p540_p0)
}
  0xd0   : > { %418 = dma.vmem_to_hbm [thread:$0]  (%p818_p9), %s759_s21, 128, %s757_s28, %s299_s29  }
  0xd1 PF: > { %s327_s18 = sand.u32 1, %s578_s12   ;;  %p819_p7 = scmp.ne.s32.totalorder %s814_s27, 0 }
  0xd2   : > { %p820_p13 = scmp.ge.s32.totalorder %s598_s17, 2  ;;  %s328_s24 = scalar_lea.sflag [#allocation4], %s327_s18 }
  0xd4   : > { %p425_p3 = pnand %p820_p13, %p819_p7 }
  0xd6   : > { %573 = dma.done.wait (!%p425_p3), %s328_s24, 128  }
  0xd7   : > { %575 = vsyncadd (!%p425_p3), %s328_s24, 4294967168  ;;  %s19_s17 = sadd.s32 1, %s598_s17   ;;  %s821_s12 = smov %s582_s13 }
  0xd8   : > { %p16_p6 = scmp.ge.s32.totalorder %s19_s17, 4   ;;  %s822_s13 = smov %s586_s14 }
  0xd9   : > { %s823_s14 = smov %s680_s26  ;;  %s824_s15 = smov %s594_s16 }
  0xda   : > { %s825_s16 = smov %s827_s20  ;;  %18 = sbr.rel (!%p16_p6) target bundleno = 6 (0x6), region = 77 }
  0xe1   :  { %333 = vsyncpa [#allocation3], 1 }
  0xe2   :  { %335 = vsyncpa [#allocation3 + $0x1], 1 }
  0xe3   :  { %336 = vsyncpa [#allocation4], 1 }
  0xe4   :  { %338 = vsyncpa [#allocation4 + $0x1], 1 }

</bundles_post_ra>
